<compile_context>
chip_gen: v5e
topology: v5e:2x2
jax: 0.10.0
libtpu: 0.0.40
codegen_flags: <defaults>
</compile_context>

<pallas_src>
import jax
import jax.numpy as jnp
from jax.experimental import pallas as pl
from jax.experimental.pallas import tpu as pltpu

LANES = 128


def lstm_classifier_kernel(xa_ref, wxb_ref, whf_ref, fch_ref, out_ref):
    seq_len = xa_ref.shape[0]
    hidden = whf_ref.shape[0]

    # Hoisted, batched input projection with folded biases:
    #   (seq_len, in+1) @ (in+1, 4*hidden); the ones column of x picks up bx+bh.
    # Kept as a value (one (8,128) f32 vreg) — no scratch round trip.
    xwx = jnp.dot(xa_ref[...], wxb_ref[...], preferred_element_type=jnp.float32)

    wh_f = whf_ref[...]   # recurrent weights stay resident across all steps

    h = jnp.zeros((1, hidden), jnp.float32)
    c = jnp.zeros((1, hidden), jnp.float32)

    # Statically unrolled recurrence (seq_len is a trace-time constant, static
    # row indices into xwx).  Per step the serial path is: one lane-dense
    # (1,4H) matmul, one full-width sigmoid, one full-width tanh, one narrow
    # tanh, and a few VPU ops.
    for t in range(seq_len):
        pre = xwx[t:t + 1, :] + jnp.dot(h, wh_f,
                                        preferred_element_type=jnp.float32)
        sig = jax.nn.sigmoid(pre)   # one full-width EUP pass covers f, i, o
        th = jnp.tanh(pre)          # one full-width EUP pass covers c_hat
        f_t = sig[:, 0 * hidden:1 * hidden]        # forget gate
        i_t = sig[:, 1 * hidden:2 * hidden]        # input gate
        c_hat = th[:, 2 * hidden:3 * hidden]       # candidate cell
        o_t = sig[:, 3 * hidden:4 * hidden]        # output gate (from old h)
        c = f_t * c + i_t * c_hat
        h = o_t * jnp.tanh(c)

    # Classifier head: weight rows [0:hidden], bias row [hidden], lane-padded
    # to 128 (zero weight columns, -1e30 bias) so the final store is lane-dense
    # and padded lanes underflow to 0 inside the log-sum-exp.
    fcw = fch_ref[0:hidden, :]
    fcb = fch_ref[hidden:hidden + 1, :]
    logits = jnp.dot(h, fcw, preferred_element_type=jnp.float32) + fcb
    m = jnp.max(logits, axis=1, keepdims=True)
    shifted = logits - m
    lse = jnp.log(jnp.sum(jnp.exp(shifted), axis=1, keepdims=True))
    out_ref[...] = shifted - lse


def lstm_classifier(x, wx, bx, wh, bh, fcw, fcb):
    """Forward pass of LSTMClassifier.

    x  : (seq_len, input_size)
    Per-gate params stacked in [f, i, c, o] order, already transposed so the
    kernel computes row-vector @ weight:
    wx : (4, input_size, hidden)   bx : (4, 1, hidden)
    wh : (4, hidden, hidden)       bh : (4, 1, hidden)
    fcw: (hidden, output_size)     fcb: (1, output_size)
    Returns (1, output_size) log-probabilities.
    """
    seq_len, _ = x.shape
    hidden = wh.shape[-1]
    out_size = fcw.shape[-1]

    # Fuse the four gates along the lane axis (order [f, i, c, o]).
    wx_f = jnp.concatenate([wx[g] for g in range(4)], axis=-1)          # (in, 4H)
    wh_f = jnp.concatenate([wh[g] for g in range(4)], axis=-1)          # (H, 4H)
    b_f = jnp.concatenate([bx[g] + bh[g] for g in range(4)], axis=-1)   # (1, 4H)

    # Fold the bias into the input projection: augment x with a ones column and
    # append the bias as one extra weight row (one fewer kernel operand/DMA).
    x_aug = jnp.concatenate([x, jnp.ones((seq_len, 1), x.dtype)], axis=1)
    wxb_f = jnp.concatenate([wx_f, b_f], axis=0)                        # (in+1, 4H)

    # Lane-dense classifier head: pad to 128 output lanes and pack weight+bias
    # into a single array (bias is the last row).
    pad = max(0, LANES - out_size)
    fcw_p = jnp.pad(fcw, ((0, 0), (0, pad)))
    fcb_p = jnp.pad(fcb, ((0, 0), (0, pad)), constant_values=-1e30)
    fc_head = jnp.concatenate([fcw_p, fcb_p], axis=0)                   # (H+1, 128)

    vmem = pl.BlockSpec(memory_space=pltpu.MemorySpace.VMEM)
    out_padded = pl.pallas_call(
        lstm_classifier_kernel,
        out_shape=jax.ShapeDtypeStruct((1, out_size + pad), jnp.float32),
        in_specs=[vmem] * 4,
        out_specs=vmem,
    )(x_aug, wxb_f, wh_f, fc_head)
    return out_padded[:, :out_size]


def lstm_classifier_ref(x, wx, bx, wh, bh, fcw, fcb):
    """Pure-JAX reference mirroring the PyTorch forward."""
    hidden = wh.shape[-1]
    h = jnp.zeros((1, hidden), jnp.float32)
    c = jnp.zeros((1, hidden), jnp.float32)
    for t in range(x.shape[0]):
        x_t = x[t].reshape(1, -1)
        f = jax.nn.sigmoid(x_t @ wx[0] + bx[0] + h @ wh[0] + bh[0])
        i = jax.nn.sigmoid(x_t @ wx[1] + bx[1] + h @ wh[1] + bh[1])
        ch = jnp.tanh(x_t @ wx[2] + bx[2] + h @ wh[2] + bh[2])
        c = f * c + i * ch
        o = jax.nn.sigmoid(x_t @ wx[3] + bx[3] + h @ wh[3] + bh[3])
        h = o * jnp.tanh(c)
    logits = h @ fcw + fcb
    return jax.nn.log_softmax(logits, axis=1)


if __name__ == "__main__":
    seq_len, input_size, hidden_size, output_size = 8, 16, 32, 10

    key = jax.random.PRNGKey(0)
    keys = jax.random.split(key, 7)
    # Deterministic synthetic parameters (shapes from LSTMClassifier.__init__).
    x = jax.random.normal(keys[0], (seq_len, input_size), jnp.float32)
    wx = 0.1 * jax.random.normal(keys[1], (4, input_size, hidden_size), jnp.float32)
    bx = 0.1 * jax.random.normal(keys[2], (4, 1, hidden_size), jnp.float32)
    wh = 0.1 * jax.random.normal(keys[3], (4, hidden_size, hidden_size), jnp.float32)
    bh = 0.1 * jax.random.normal(keys[4], (4, 1, hidden_size), jnp.float32)
    fcw = 0.1 * jax.random.normal(keys[5], (hidden_size, output_size), jnp.float32)
    fcb = 0.1 * jax.random.normal(keys[6], (1, output_size), jnp.float32)

    out = lstm_classifier(x, wx, bx, wh, bh, fcw, fcb)
    jax.block_until_ready(out)

    ref = lstm_classifier_ref(x, wx, bx, wh, bh, fcw, fcb)
    assert out.shape == (1, output_size)
    assert jnp.allclose(out, ref, atol=1e-5, rtol=1e-5), (out, ref)

    print("KERNEL_OK")
</pallas_src>

<mosaic_0001>
module attributes {stable_mosaic.version = 11 : i64} {
  func.func @lstm_classifier_kernel(%arg0: memref<8x17xf32, #tpu.memory_space<vmem>>, %arg1: memref<17x128xf32, #tpu.memory_space<vmem>>, %arg2: memref<32x128xf32, #tpu.memory_space<vmem>>, %arg3: memref<33x128xf32, #tpu.memory_space<vmem>>, %arg4: memref<1x128xf32, #tpu.memory_space<vmem>>) attributes {dimension_semantics = [], scalar_prefetch = 0 : i64, scratch_operands = 0 : i64, tpu.core_type = #tpu.core_type<tc>} {
    %c0 = arith.constant 0 : index
    %c0_0 = arith.constant 0 : index
    %0 = vector.load %arg0[%c0, %c0_0] : memref<8x17xf32, #tpu.memory_space<vmem>>, vector<8x17xf32>
    %c0_1 = arith.constant 0 : index
    %c0_2 = arith.constant 0 : index
    %1 = vector.load %arg1[%c0_1, %c0_2] : memref<17x128xf32, #tpu.memory_space<vmem>>, vector<17x128xf32>
    %cst = arith.constant dense<0.000000e+00> : vector<8x128xf32>
    %2 = tpu.matmul %0, %1, %cst {dimension_numbers = #tpu.dot_dimension_numbers<[1], [0], [0], [1], [0, 0, 1, 1], [], []>} : vector<8x17xf32>, vector<17x128xf32>, vector<8x128xf32> -> vector<8x128xf32>
    %c0_3 = arith.constant 0 : index
    %c0_4 = arith.constant 0 : index
    %3 = vector.load %arg2[%c0_3, %c0_4] : memref<32x128xf32, #tpu.memory_space<vmem>>, vector<32x128xf32>
    %cst_5 = arith.constant 0.000000e+00 : f32
    %4 = vector.broadcast %cst_5 : f32 to vector<1x32xf32>
    %cst_6 = arith.constant 0.000000e+00 : f32
    %5 = vector.broadcast %cst_6 : f32 to vector<1x32xf32>
    %6 = vector.extract_strided_slice %2 {offsets = [0, 0], sizes = [1, 128], strides = [1, 1]} : vector<8x128xf32> to vector<1x128xf32>
    %cst_7 = arith.constant dense<0.000000e+00> : vector<1x128xf32>
    %7 = tpu.matmul %4, %3, %cst_7 {dimension_numbers = #tpu.dot_dimension_numbers<[1], [0], [0], [1], [0, 0, 1, 1], [], []>} : vector<1x32xf32>, vector<32x128xf32>, vector<1x128xf32> -> vector<1x128xf32>
    %8 = arith.addf %6, %7 : vector<1x128xf32>
    %9 = arith.negf %8 : vector<1x128xf32>
    %10 = math.exp %9 : vector<1x128xf32>
    %cst_8 = arith.constant 1.000000e+00 : f32
    %11 = vector.broadcast %cst_8 : f32 to vector<1x128xf32>
    %12 = arith.addf %11, %10 : vector<1x128xf32>
    %13 = arith.divf %11, %12 : vector<1x128xf32>
    %14 = math.tanh %8 : vector<1x128xf32>
    %15 = vector.extract_strided_slice %13 {offsets = [0, 0], sizes = [1, 32], strides = [1, 1]} : vector<1x128xf32> to vector<1x32xf32>
    %16 = vector.extract_strided_slice %13 {offsets = [0, 32], sizes = [1, 32], strides = [1, 1]} : vector<1x128xf32> to vector<1x32xf32>
    %17 = vector.extract_strided_slice %14 {offsets = [0, 64], sizes = [1, 32], strides = [1, 1]} : vector<1x128xf32> to vector<1x32xf32>
    %18 = vector.extract_strided_slice %13 {offsets = [0, 96], sizes = [1, 32], strides = [1, 1]} : vector<1x128xf32> to vector<1x32xf32>
    %19 = arith.mulf %15, %5 : vector<1x32xf32>
    %20 = arith.mulf %16, %17 : vector<1x32xf32>
    %21 = arith.addf %19, %20 : vector<1x32xf32>
    %22 = math.tanh %21 : vector<1x32xf32>
    %23 = arith.mulf %18, %22 : vector<1x32xf32>
    %24 = vector.extract_strided_slice %2 {offsets = [1, 0], sizes = [1, 128], strides = [1, 1]} : vector<8x128xf32> to vector<1x128xf32>
    %cst_9 = arith.constant dense<0.000000e+00> : vector<1x128xf32>
    %25 = tpu.matmul %23, %3, %cst_9 {dimension_numbers = #tpu.dot_dimension_numbers<[1], [0], [0], [1], [0, 0, 1, 1], [], []>} : vector<1x32xf32>, vector<32x128xf32>, vector<1x128xf32> -> vector<1x128xf32>
    %26 = arith.addf %24, %25 : vector<1x128xf32>
    %27 = arith.negf %26 : vector<1x128xf32>
    %28 = math.exp %27 : vector<1x128xf32>
    %cst_10 = arith.constant 1.000000e+00 : f32
    %29 = vector.broadcast %cst_10 : f32 to vector<1x128xf32>
    %30 = arith.addf %29, %28 : vector<1x128xf32>
    %31 = arith.divf %29, %30 : vector<1x128xf32>
    %32 = math.tanh %26 : vector<1x128xf32>
    %33 = vector.extract_strided_slice %31 {offsets = [0, 0], sizes = [1, 32], strides = [1, 1]} : vector<1x128xf32> to vector<1x32xf32>
    %34 = vector.extract_strided_slice %31 {offsets = [0, 32], sizes = [1, 32], strides = [1, 1]} : vector<1x128xf32> to vector<1x32xf32>
    %35 = vector.extract_strided_slice %32 {offsets = [0, 64], sizes = [1, 32], strides = [1, 1]} : vector<1x128xf32> to vector<1x32xf32>
    %36 = vector.extract_strided_slice %31 {offsets = [0, 96], sizes = [1, 32], strides = [1, 1]} : vector<1x128xf32> to vector<1x32xf32>
    %37 = arith.mulf %33, %21 : vector<1x32xf32>
    %38 = arith.mulf %34, %35 : vector<1x32xf32>
    %39 = arith.addf %37, %38 : vector<1x32xf32>
    %40 = math.tanh %39 : vector<1x32xf32>
    %41 = arith.mulf %36, %40 : vector<1x32xf32>
    %42 = vector.extract_strided_slice %2 {offsets = [2, 0], sizes = [1, 128], strides = [1, 1]} : vector<8x128xf32> to vector<1x128xf32>
    %cst_11 = arith.constant dense<0.000000e+00> : vector<1x128xf32>
    %43 = tpu.matmul %41, %3, %cst_11 {dimension_numbers = #tpu.dot_dimension_numbers<[1], [0], [0], [1], [0, 0, 1, 1], [], []>} : vector<1x32xf32>, vector<32x128xf32>, vector<1x128xf32> -> vector<1x128xf32>
    %44 = arith.addf %42, %43 : vector<1x128xf32>
    %45 = arith.negf %44 : vector<1x128xf32>
    %46 = math.exp %45 : vector<1x128xf32>
    %cst_12 = arith.constant 1.000000e+00 : f32
    %47 = vector.broadcast %cst_12 : f32 to vector<1x128xf32>
    %48 = arith.addf %47, %46 : vector<1x128xf32>
    %49 = arith.divf %47, %48 : vector<1x128xf32>
    %50 = math.tanh %44 : vector<1x128xf32>
    %51 = vector.extract_strided_slice %49 {offsets = [0, 0], sizes = [1, 32], strides = [1, 1]} : vector<1x128xf32> to vector<1x32xf32>
    %52 = vector.extract_strided_slice %49 {offsets = [0, 32], sizes = [1, 32], strides = [1, 1]} : vector<1x128xf32> to vector<1x32xf32>
    %53 = vector.extract_strided_slice %50 {offsets = [0, 64], sizes = [1, 32], strides = [1, 1]} : vector<1x128xf32> to vector<1x32xf32>
    %54 = vector.extract_strided_slice %49 {offsets = [0, 96], sizes = [1, 32], strides = [1, 1]} : vector<1x128xf32> to vector<1x32xf32>
    %55 = arith.mulf %51, %39 : vector<1x32xf32>
    %56 = arith.mulf %52, %53 : vector<1x32xf32>
    %57 = arith.addf %55, %56 : vector<1x32xf32>
    %58 = math.tanh %57 : vector<1x32xf32>
    %59 = arith.mulf %54, %58 : vector<1x32xf32>
    %60 = vector.extract_strided_slice %2 {offsets = [3, 0], sizes = [1, 128], strides = [1, 1]} : vector<8x128xf32> to vector<1x128xf32>
    %cst_13 = arith.constant dense<0.000000e+00> : vector<1x128xf32>
    %61 = tpu.matmul %59, %3, %cst_13 {dimension_numbers = #tpu.dot_dimension_numbers<[1], [0], [0], [1], [0, 0, 1, 1], [], []>} : vector<1x32xf32>, vector<32x128xf32>, vector<1x128xf32> -> vector<1x128xf32>
    %62 = arith.addf %60, %61 : vector<1x128xf32>
    %63 = arith.negf %62 : vector<1x128xf32>
    %64 = math.exp %63 : vector<1x128xf32>
    %cst_14 = arith.constant 1.000000e+00 : f32
    %65 = vector.broadcast %cst_14 : f32 to vector<1x128xf32>
    %66 = arith.addf %65, %64 : vector<1x128xf32>
    %67 = arith.divf %65, %66 : vector<1x128xf32>
    %68 = math.tanh %62 : vector<1x128xf32>
    %69 = vector.extract_strided_slice %67 {offsets = [0, 0], sizes = [1, 32], strides = [1, 1]} : vector<1x128xf32> to vector<1x32xf32>
    %70 = vector.extract_strided_slice %67 {offsets = [0, 32], sizes = [1, 32], strides = [1, 1]} : vector<1x128xf32> to vector<1x32xf32>
    %71 = vector.extract_strided_slice %68 {offsets = [0, 64], sizes = [1, 32], strides = [1, 1]} : vector<1x128xf32> to vector<1x32xf32>
    %72 = vector.extract_strided_slice %67 {offsets = [0, 96], sizes = [1, 32], strides = [1, 1]} : vector<1x128xf32> to vector<1x32xf32>
    %73 = arith.mulf %69, %57 : vector<1x32xf32>
    %74 = arith.mulf %70, %71 : vector<1x32xf32>
    %75 = arith.addf %73, %74 : vector<1x32xf32>
    %76 = math.tanh %75 : vector<1x32xf32>
    %77 = arith.mulf %72, %76 : vector<1x32xf32>
    %78 = vector.extract_strided_slice %2 {offsets = [4, 0], sizes = [1, 128], strides = [1, 1]} : vector<8x128xf32> to vector<1x128xf32>
    %cst_15 = arith.constant dense<0.000000e+00> : vector<1x128xf32>
    %79 = tpu.matmul %77, %3, %cst_15 {dimension_numbers = #tpu.dot_dimension_numbers<[1], [0], [0], [1], [0, 0, 1, 1], [], []>} : vector<1x32xf32>, vector<32x128xf32>, vector<1x128xf32> -> vector<1x128xf32>
    %80 = arith.addf %78, %79 : vector<1x128xf32>
    %81 = arith.negf %80 : vector<1x128xf32>
    %82 = math.exp %81 : vector<1x128xf32>
    %cst_16 = arith.constant 1.000000e+00 : f32
    %83 = vector.broadcast %cst_16 : f32 to vector<1x128xf32>
    %84 = arith.addf %83, %82 : vector<1x128xf32>
    %85 = arith.divf %83, %84 : vector<1x128xf32>
    %86 = math.tanh %80 : vector<1x128xf32>
    %87 = vector.extract_strided_slice %85 {offsets = [0, 0], sizes = [1, 32], strides = [1, 1]} : vector<1x128xf32> to vector<1x32xf32>
    %88 = vector.extract_strided_slice %85 {offsets = [0, 32], sizes = [1, 32], strides = [1, 1]} : vector<1x128xf32> to vector<1x32xf32>
    %89 = vector.extract_strided_slice %86 {offsets = [0, 64], sizes = [1, 32], strides = [1, 1]} : vector<1x128xf32> to vector<1x32xf32>
    %90 = vector.extract_strided_slice %85 {offsets = [0, 96], sizes = [1, 32], strides = [1, 1]} : vector<1x128xf32> to vector<1x32xf32>
    %91 = arith.mulf %87, %75 : vector<1x32xf32>
    %92 = arith.mulf %88, %89 : vector<1x32xf32>
    %93 = arith.addf %91, %92 : vector<1x32xf32>
    %94 = math.tanh %93 : vector<1x32xf32>
    %95 = arith.mulf %90, %94 : vector<1x32xf32>
    %96 = vector.extract_strided_slice %2 {offsets = [5, 0], sizes = [1, 128], strides = [1, 1]} : vector<8x128xf32> to vector<1x128xf32>
    %cst_17 = arith.constant dense<0.000000e+00> : vector<1x128xf32>
    %97 = tpu.matmul %95, %3, %cst_17 {dimension_numbers = #tpu.dot_dimension_numbers<[1], [0], [0], [1], [0, 0, 1, 1], [], []>} : vector<1x32xf32>, vector<32x128xf32>, vector<1x128xf32> -> vector<1x128xf32>
    %98 = arith.addf %96, %97 : vector<1x128xf32>
    %99 = arith.negf %98 : vector<1x128xf32>
    %100 = math.exp %99 : vector<1x128xf32>
    %cst_18 = arith.constant 1.000000e+00 : f32
    %101 = vector.broadcast %cst_18 : f32 to vector<1x128xf32>
    %102 = arith.addf %101, %100 : vector<1x128xf32>
    %103 = arith.divf %101, %102 : vector<1x128xf32>
    %104 = math.tanh %98 : vector<1x128xf32>
    %105 = vector.extract_strided_slice %103 {offsets = [0, 0], sizes = [1, 32], strides = [1, 1]} : vector<1x128xf32> to vector<1x32xf32>
    %106 = vector.extract_strided_slice %103 {offsets = [0, 32], sizes = [1, 32], strides = [1, 1]} : vector<1x128xf32> to vector<1x32xf32>
    %107 = vector.extract_strided_slice %104 {offsets = [0, 64], sizes = [1, 32], strides = [1, 1]} : vector<1x128xf32> to vector<1x32xf32>
    %108 = vector.extract_strided_slice %103 {offsets = [0, 96], sizes = [1, 32], strides = [1, 1]} : vector<1x128xf32> to vector<1x32xf32>
    %109 = arith.mulf %105, %93 : vector<1x32xf32>
    %110 = arith.mulf %106, %107 : vector<1x32xf32>
    %111 = arith.addf %109, %110 : vector<1x32xf32>
    %112 = math.tanh %111 : vector<1x32xf32>
    %113 = arith.mulf %108, %112 : vector<1x32xf32>
    %114 = vector.extract_strided_slice %2 {offsets = [6, 0], sizes = [1, 128], strides = [1, 1]} : vector<8x128xf32> to vector<1x128xf32>
    %cst_19 = arith.constant dense<0.000000e+00> : vector<1x128xf32>
    %115 = tpu.matmul %113, %3, %cst_19 {dimension_numbers = #tpu.dot_dimension_numbers<[1], [0], [0], [1], [0, 0, 1, 1], [], []>} : vector<1x32xf32>, vector<32x128xf32>, vector<1x128xf32> -> vector<1x128xf32>
    %116 = arith.addf %114, %115 : vector<1x128xf32>
    %117 = arith.negf %116 : vector<1x128xf32>
    %118 = math.exp %117 : vector<1x128xf32>
    %cst_20 = arith.constant 1.000000e+00 : f32
    %119 = vector.broadcast %cst_20 : f32 to vector<1x128xf32>
    %120 = arith.addf %119, %118 : vector<1x128xf32>
    %121 = arith.divf %119, %120 : vector<1x128xf32>
    %122 = math.tanh %116 : vector<1x128xf32>
    %123 = vector.extract_strided_slice %121 {offsets = [0, 0], sizes = [1, 32], strides = [1, 1]} : vector<1x128xf32> to vector<1x32xf32>
    %124 = vector.extract_strided_slice %121 {offsets = [0, 32], sizes = [1, 32], strides = [1, 1]} : vector<1x128xf32> to vector<1x32xf32>
    %125 = vector.extract_strided_slice %122 {offsets = [0, 64], sizes = [1, 32], strides = [1, 1]} : vector<1x128xf32> to vector<1x32xf32>
    %126 = vector.extract_strided_slice %121 {offsets = [0, 96], sizes = [1, 32], strides = [1, 1]} : vector<1x128xf32> to vector<1x32xf32>
    %127 = arith.mulf %123, %111 : vector<1x32xf32>
    %128 = arith.mulf %124, %125 : vector<1x32xf32>
    %129 = arith.addf %127, %128 : vector<1x32xf32>
    %130 = math.tanh %129 : vector<1x32xf32>
    %131 = arith.mulf %126, %130 : vector<1x32xf32>
    %132 = vector.extract_strided_slice %2 {offsets = [7, 0], sizes = [1, 128], strides = [1, 1]} : vector<8x128xf32> to vector<1x128xf32>
    %cst_21 = arith.constant dense<0.000000e+00> : vector<1x128xf32>
    %133 = tpu.matmul %131, %3, %cst_21 {dimension_numbers = #tpu.dot_dimension_numbers<[1], [0], [0], [1], [0, 0, 1, 1], [], []>} : vector<1x32xf32>, vector<32x128xf32>, vector<1x128xf32> -> vector<1x128xf32>
    %134 = arith.addf %132, %133 : vector<1x128xf32>
    %135 = arith.negf %134 : vector<1x128xf32>
    %136 = math.exp %135 : vector<1x128xf32>
    %cst_22 = arith.constant 1.000000e+00 : f32
    %137 = vector.broadcast %cst_22 : f32 to vector<1x128xf32>
    %138 = arith.addf %137, %136 : vector<1x128xf32>
    %139 = arith.divf %137, %138 : vector<1x128xf32>
    %140 = math.tanh %134 : vector<1x128xf32>
    %141 = vector.extract_strided_slice %139 {offsets = [0, 0], sizes = [1, 32], strides = [1, 1]} : vector<1x128xf32> to vector<1x32xf32>
    %142 = vector.extract_strided_slice %139 {offsets = [0, 32], sizes = [1, 32], strides = [1, 1]} : vector<1x128xf32> to vector<1x32xf32>
    %143 = vector.extract_strided_slice %140 {offsets = [0, 64], sizes = [1, 32], strides = [1, 1]} : vector<1x128xf32> to vector<1x32xf32>
    %144 = vector.extract_strided_slice %139 {offsets = [0, 96], sizes = [1, 32], strides = [1, 1]} : vector<1x128xf32> to vector<1x32xf32>
    %145 = arith.mulf %141, %129 : vector<1x32xf32>
    %146 = arith.mulf %142, %143 : vector<1x32xf32>
    %147 = arith.addf %145, %146 : vector<1x32xf32>
    %148 = math.tanh %147 : vector<1x32xf32>
    %149 = arith.mulf %144, %148 : vector<1x32xf32>
    %c0_23 = arith.constant 0 : index
    %c0_24 = arith.constant 0 : index
    %150 = vector.load %arg3[%c0_23, %c0_24] : memref<33x128xf32, #tpu.memory_space<vmem>>, vector<32x128xf32>
    %c32 = arith.constant 32 : index
    %c0_25 = arith.constant 0 : index
    %151 = vector.load %arg3[%c32, %c0_25] : memref<33x128xf32, #tpu.memory_space<vmem>>, vector<1x128xf32>
    %cst_26 = arith.constant dense<0.000000e+00> : vector<1x128xf32>
    %152 = tpu.matmul %149, %150, %cst_26 {dimension_numbers = #tpu.dot_dimension_numbers<[1], [0], [0], [1], [0, 0, 1, 1], [], []>} : vector<1x32xf32>, vector<32x128xf32>, vector<1x128xf32> -> vector<1x128xf32>
    %153 = arith.addf %152, %151 : vector<1x128xf32>
    %cst_27 = arith.constant dense<0xFF800000> : vector<1xf32>
    %154 = vector.multi_reduction <maximumf>, %153, %cst_27 [1] : vector<1x128xf32> to vector<1xf32>
    %155 = vector.shape_cast %154 : vector<1xf32> to vector<1x1xf32>
    %156 = vector.broadcast %155 : vector<1x1xf32> to vector<1x128xf32>
    %157 = arith.subf %153, %156 : vector<1x128xf32>
    %158 = math.exp %157 : vector<1x128xf32>
    %cst_28 = arith.constant dense<0.000000e+00> : vector<1xf32>
    %159 = vector.multi_reduction <add>, %158, %cst_28 [1] : vector<1x128xf32> to vector<1xf32>
    %160 = vector.shape_cast %159 : vector<1xf32> to vector<1x1xf32>
    %161 = math.log %160 : vector<1x1xf32>
    %162 = vector.broadcast %161 : vector<1x1xf32> to vector<1x128xf32>
    %163 = arith.subf %157, %162 : vector<1x128xf32>
    %c0_29 = arith.constant 0 : index
    %c0_30 = arith.constant 0 : index
    %164 = vector.load %arg4[%c0_29, %c0_30] : memref<1x128xf32, #tpu.memory_space<vmem>>, vector<1x128xf32>
    tpu.vector_store %arg4[%c0_29, %c0_30], %163 {strides = array<i32>} : memref<1x128xf32, #tpu.memory_space<vmem>>, vector<1x128xf32>,
    return
  }
}

</mosaic_0001>

<bundles_post_ra>
// kernel: tpu_custom_call.1
= control target key start
LH: loop header
LB: loop body
LE: loop exit
PB: predicated region body
PF: predicated region fallthrough
CT: control target
= control target key end

     0   :  { %9 = vsyncpa [#allocation3], 0  ;;  %s1056_s0 = inlined_call_operand.hbm [shape: f32[8,17], index: 0, kind: input, shape index: {}]   ;;  %s1057_s1 = inlined_call_operand.hbm [shape: f32[17,128], index: 1, kind: input, shape index: {}]   ;;  %s1058_s2 = inlined_call_operand.hbm [shape: f32[32,128], index: 2, kind: input, shape index: {}]   ;;  %s1059_s3 = inlined_call_operand.hbm [shape: f32[33,128], index: 3, kind: input, shape index: {}]   ;;  %s1060_s4 = inlined_call_operand.hbm [shape: f32[1,128], index: 4, kind: output, shape index: {}]  }
   0x1   :  { %10 = vsyncpa [#allocation6], 0 }
   0x2   :  { %11 = vsyncpa [#allocation9], 0  ;;  %s28_s17 = sshll.u32 %s1057_s1, 4  ;;  %s29_s17 = int_to_ptr.hbm [resolvable:$true] %s28_s17 }
   0x3   :  { %12 = vsyncpa [#allocation4], 0  ;;  %s953_s18 = smov [#allocation5]   ;;  %s18_s22 = sshll.u32 %s1056_s0, 4  ;;  %s19_s22 = int_to_ptr.hbm [resolvable:$true] %s18_s22 }
   0x4   :  { %s30_s19 = sshll.u32 %s953_s18, 4  ;;  %s954_s23 = smov 128   ;;  %s31_s19 = int_to_ptr.vmem [resolvable:$true] %s30_s19 }
   0x5   :  { %s955_s24 = smov 8   ;;  %s956_s25 = smov [#allocation2]  }
   0x6   :  { %36 = dma.hbm_to_vmem [thread:$0]  %s29_s17, 384, %s31_s19, [#allocation6], %s954_s23, %s954_s23, %s955_s24  }
   0x7   :  { %s20_s26 = sshll.u32 %s956_s25, 4  ;;  %s41_s29 = sshll.u32 %s1058_s2, 4  ;;  %s21_s26 = int_to_ptr.vmem [resolvable:$true] %s20_s26  ;;  %s42_s29 = int_to_ptr.hbm [resolvable:$true] %s41_s29 }
   0x8   :  { %23 = dma.hbm_to_vmem [thread:$0]  %s19_s22, 128, %s21_s26, [#allocation3]  }
   0x9   :  { %s54_s5 = sshll.u32 %s1059_s3, 4  ;;  %s957_s6 = smov [#allocation7]   ;;  %s55_s5 = int_to_ptr.hbm [resolvable:$true] %s54_s5 }
   0xa   :  { %s43_s7 = sshll.u32 %s957_s6, 4  ;;  %s958_s0 = smov [#allocation8]   ;;  %s44_s7 = int_to_ptr.vmem [resolvable:$true] %s43_s7 }
   0xb   :  { %49 = dma.hbm_to_vmem [thread:$0]  %s42_s29, 512, %s44_s7, [#allocation6], %s954_s23, %s954_s23, %s955_s24  }
   0xc   :  { %s56_s8 = sshll.u32 %s958_s0, 4  ;;  %s57_s8 = int_to_ptr.vmem [resolvable:$true] %s56_s8 }
   0xd   :  { %62 = dma.hbm_to_vmem [thread:$0]  %s55_s5, 640, %s57_s8, [#allocation9], %s954_s23, %s954_s23, %s955_s24  }
   0xe   :  { %945 = dma.done.wait [#allocation3], 128  }
   0xf   :  { %946 = vsyncadd [#allocation3], 4294967168 }
  0x10   :  { %947 = dma.done.wait [#allocation6], 896  }
  0x11   :  { %948 = vsyncadd [#allocation6], 4294966400 }
  0x12   :  { %949 = dma.done.wait [#allocation9], 640  }
  0x13   :  { %950 = vsyncadd [#allocation9], 4294966656  ;;  %vm87_vm0 = vcmask 1040384   ;;  %v114_v0 = vld [vmem:[#allocation7 + $0x18] sm:$0xff]  ;;  %v113_v2 = vld [vmem:[#allocation7 + $0x10] sm:$0xff]  ;;  %vm83_vm1 = vcmask 138240  }
  0x14   :  { %v82_v1 = vld [vmem:[#allocation5 + $0x10] sm:$0x1]  ;;  %131 = vmatpush.msra.mxu1 %v114_v0  ;;  %v81_v3 = vld [vmem:[#allocation5 + $0x8] sm:$0xff]  ;;  %v112_v4 = vld [vmem:[#allocation7 + $0x8] sm:$0xff]  ;;  %194 = vmatpush.msra.mxu2 %v114_v0  ;;  %v959_v8 = vmov 0.0   ;;  %s960_s2 = smov 96  }
  0x15   :  { %729 = vmatpush.msk.msra.mxu0 %vm87_vm0, %v82_v1  ;;  %v80_v5 = vld [vmem:[#allocation5] sm:$0xff]  ;;  %264 = vmatpush.msra.mxu3 %v114_v0  ;;  %v79_v6 = vld [vmem:[#allocation2] sm:$0xff]  ;;  %s961_s3 = smov 32   ;;  %vm115_vm6 = vcmask 261120   ;;  %s962_s9 = smov [#allocation10]  }
  0x16   :  { %132 = vmatpush.msra.mxu1 %v113_v2  ;;  %v111_v7 = vld [vmem:[#allocation7] sm:$0xff]  ;;  %195 = vmatpush.msra.mxu2 %v113_v2  ;;  %s715_s10 = sshll.u32 %s962_s9, 4  ;;  %s717_s13 = sshll.u32 %s1060_s4, 4  ;;  %s716_s10 = int_to_ptr.vmem [resolvable:$true] %s715_s10  ;;  %s718_s13 = int_to_ptr.hbm [resolvable:$true] %s717_s13 }
  0x17   :  { %105 = vmatpush.msra.mxu0 %v81_v3  ;;  %265 = vmatpush.msra.mxu3 %v113_v2 }
  0x18   :  { %133 = vmatpush.msra.mxu1 %v112_v4  ;;  %196 = vmatpush.msra.mxu2 %v112_v4 }
  0x19   :  { %106 = vmatpush.msra.mxu0 %v80_v5  ;;  %266 = vmatpush.msra.mxu3 %v112_v4 }
  0x1a   :  { %730 = vmatmul.msk.f32.vlgmr.msra.gmra.mxu0 %vm83_vm1, %v79_v6  ;;  %134 = vmatpush.msra.mxu1 %v111_v7 }
  0x1b   :  { %135 = vmatmul.f32.vlgmr.msra.gmra.mxu1 %v959_v8  ;;  %197 = vmatpush.msra.mxu2 %v111_v7 }
  0x1c   :  { %267 = vmatpush.msra.mxu3 %v111_v7  ;;  %334 = vmatpush.msrb.mxu0 %v114_v0 }
  0x1d   :  { %404 = vmatpush.msrb.mxu1 %v114_v0  ;;  %474 = vmatpush.msrb.mxu2 %v114_v0 }
  0x1e   :  { %335 = vmatpush.msrb.mxu0 %v113_v2  ;;  %544 = vmatpush.msrb.mxu3 %v114_v0 }
  0x1f   :  { %405 = vmatpush.msrb.mxu1 %v113_v2  ;;  %475 = vmatpush.msrb.mxu2 %v113_v2 }
  0x20   :  { %336 = vmatpush.msrb.mxu0 %v112_v4  ;;  %545 = vmatpush.msrb.mxu3 %v113_v2 }
  0x21   :  { %406 = vmatpush.msrb.mxu1 %v112_v4  ;;  %476 = vmatpush.msrb.mxu2 %v112_v4 }
  0x22   :  { %337 = vmatpush.msrb.mxu0 %v111_v7  ;;  %546 = vmatpush.msrb.mxu3 %v112_v4 }
  0x23   :  { %407 = vmatpush.msrb.mxu1 %v111_v7  ;;  %477 = vmatpush.msrb.mxu2 %v111_v7 }
  0x24   :  { %547 = vmatpush.msrb.mxu3 %v111_v7  ;;  %614 = vmatpush.msra.mxu0 %v114_v0 }
  0x26   :  { %615 = vmatpush.msra.mxu0 %v113_v2 }
  0x28   :  { %616 = vmatpush.msra.mxu0 %v112_v4 }
  0x2a   :  { %617 = vmatpush.msra.mxu0 %v111_v7 }
  0x97   :  { %v1001_v9 = vpop.f32.mrf.mxu0 }
  0x98   :  { %v136_v10 = vpop.f32.mrf.mxu1 }
  0x99   :  { %v139_v11 = vadd.f32 %v136_v10, %v1001_v9 }
  0x9b   :  { %757 = vtanh.f32 %v139_v11  ;;  %v731_v13 = vmul.f32 -1.442695, %v139_v11 }
  0x9d   :  { %759 = vpow2.f32 %v731_v13 }
  0xa1   :  { %v758_v12 = vpop.eup %757 }
  0xa2   :  { %162 = vrot.lane.b32.xlu0 %v758_v12, %s960_s2 }
  0xa3   :  { %v760_v14 = vpop.eup %759 }
  0xa4   :  { %v143_v15 = vadd.f32 1.0, %v760_v14 }
  0xa6   :  { %761 = vrcp.f32 %v143_v15  ;;  %v155_v21 = vand.u32 2147483648, %v143_v15  ;;  %vm149_vm3 = vweird.f32 %v143_v15  ;;  %v153_v22 = vand.u32 2147483647, %v143_v15 }
  0xa8   :  { %v156_v24 = vor.u32 1.1754944e-38, %v155_v21  ;;  %vm154_vm5 = vcmp.eq.f32.partialorder %v153_v22, 8.507059e+37 }
  0xac   :  { %v762_v16 = vpop.eup %761 }
  0xad   :  { %v145_v17 = vmul.f32 %v762_v16, %v143_v15  ;;  %vm150_vm2 = vweird.f32 %v762_v16 }
  0xae   :  { %vm151_vm4 = vmor %vm149_vm3, %vm150_vm2 }
  0xaf   :  { %v146_v18 = vsub.f32 1.0, %v145_v17 }
  0xb1   :  { %v147_v19 = vmul.f32 %v762_v16, %v146_v18 }
  0xb3   :  { %v148_v20 = vadd.f32 %v762_v16, %v147_v19 }
  0xb5   :  { %v152_v23 = vsel %vm151_vm4, %v762_v16, %v148_v20 }
  0xb6   :  { %v157_v26 = vsel %vm154_vm5, %v156_v24, %v152_v23 }
  0xb7   :  { %v160_v28 = vmul.f32 0.0, %v157_v26 }
 0x114   :  { %v163_v25 = vpop.permute.xlu0 %162 }
 0x115   :  { %v165_v27 = vmul.f32 %v163_v25, %v157_v26 }
 0x117   :  { %167 = vrot.lane.b32.xlu0 %v165_v27, %s960_s2 }
 0x189   :  { %v168_v29 = vpop.permute.xlu0 %167 }
 0x18a   :  { %v170_v30 = vadd.f32 %v168_v29, %v160_v28 }
 0x18c   :  { %763 = vtanh.f32 %v170_v30  ;;  %v227_v54 = vrot.slane %v170_v30, 7 }
 0x192   :  { %v764_v31 = vpop.eup %763 }
 0x193   :  { %173 = vrot.lane.b32.xlu1 %v764_v31, %s960_s2 }
 0x205   :  { %v174_v32 = vpop.permute.xlu1 %173 }
 0x206   :  { %v176_v33 = vmul.f32 %v174_v32, %v157_v26 }
 0x208   :  { %178 = vrot.lane.b32.xlu1 %v176_v33, %s961_s3 }
 0x27a   :  { %v179_v34 = vpop.permute.xlu1 %178 }
 0x27b   :  { %732 = vmatmul.msk.f32.vlgmr.msra.gmra.mxu2 %vm115_vm6, %v179_v34 }
 0x2fe   :  { %v199_v35 = vpop.f32.mrf.mxu2 }
 0x2ff   :  { %v203_v36 = vrot.slane %v199_v35, 7 }
 0x301   :  { %v205_v37 = vadd.f32 %v203_v36, %v1001_v9 }
 0x303   :  { %765 = vtanh.f32 %v205_v37  ;;  %v733_v39 = vmul.f32 -1.442695, %v205_v37 }
 0x305   :  { %767 = vpow2.f32 %v733_v39 }
 0x309   :  { %v766_v38 = vpop.eup %765 }
 0x30a   :  { %231 = vrot.lane.b32.xlu2 %v766_v38, %s960_s2 }
 0x30b   :  { %v768_v40 = vpop.eup %767 }
 0x30c   :  { %v209_v41 = vadd.f32 1.0, %v768_v40 }
 0x30e   :  { %769 = vrcp.f32 %v209_v41  ;;  %v221_v47 = vand.u32 2147483648, %v209_v41  ;;  %vm215_vm8 = vweird.f32 %v209_v41  ;;  %v219_v48 = vand.u32 2147483647, %v209_v41 }
 0x310   :  { %v222_v50 = vor.u32 1.1754944e-38, %v221_v47  ;;  %vm220_vm10 = vcmp.eq.f32.partialorder %v219_v48, 8.507059e+37 }
 0x314   :  { %v770_v42 = vpop.eup %769 }
 0x315   :  { %v211_v43 = vmul.f32 %v770_v42, %v209_v41  ;;  %vm216_vm7 = vweird.f32 %v770_v42 }
 0x316   :  { %vm217_vm9 = vmor %vm215_vm8, %vm216_vm7 }
 0x317   :  { %v212_v44 = vsub.f32 1.0, %v211_v43 }
 0x319   :  { %v213_v45 = vmul.f32 %v770_v42, %v212_v44 }
 0x31b   :  { %v214_v46 = vadd.f32 %v770_v42, %v213_v45 }
 0x31d   :  { %v218_v49 = vsel %vm217_vm9, %v770_v42, %v214_v46 }
 0x31e   :  { %v223_v52 = vsel %vm220_vm10, %v222_v50, %v218_v49 }
 0x31f   :  { %v229_v55 = vmul.f32 %v227_v54, %v223_v52 }
 0x364   :  { %v232_v51 = vpop.permute.xlu2 %231 }
 0x365   :  { %v234_v53 = vmul.f32 %v232_v51, %v223_v52 }
 0x367   :  { %236 = vrot.lane.b32.xlu2 %v234_v53, %s960_s2 }
 0x3c1   :  { %v237_v56 = vpop.permute.xlu2 %236 }
 0x3c2   :  { %v239_v57 = vadd.f32 %v237_v56, %v229_v55 }
 0x3c4   :  { %771 = vtanh.f32 %v239_v57  ;;  %v297_v19 = vrot.slane %v239_v57, 7 }
 0x3ca   :  { %v772_v58 = vpop.eup %771 }
 0x3cb   :  { %242 = vrot.lane.b32.xlu0 %v772_v58, %s960_s2 }
 0x43d   :  { %v243_v59 = vpop.permute.xlu0 %242 }
 0x43e   :  { %v245_v60 = vmul.f32 %v243_v59, %v223_v52 }
 0x440   :  { %v247_v61 = vrot.slane %v245_v60, 1 }
 0x442   :  { %248 = vrot.lane.b32.xlu1 %v247_v61, %s961_s3 }
 0x4b4   :  { %v249_v62 = vpop.permute.xlu1 %248 }
 0x4b5   :  { %734 = vmatmul.msk.f32.vlgmr.msra.gmra.mxu3 %vm115_vm6, %v249_v62 }
 0x538   :  { %v269_v63 = vpop.f32.mrf.mxu3 }
 0x539   :  { %v273_v0 = vrot.slane %v269_v63, 6 }
 0x53b   :  { %v275_v1 = vadd.f32 %v273_v0, %v1001_v9 }
 0x53d   :  { %773 = vtanh.f32 %v275_v1  ;;  %v735_v3 = vmul.f32 -1.442695, %v275_v1 }
 0x53f   :  { %775 = vpow2.f32 %v735_v3 }
 0x543   :  { %v774_v2 = vpop.eup %773 }
 0x544   :  { %301 = vrot.lane.b32.xlu2 %v774_v2, %s960_s2 }
 0x545   :  { %v776_v4 = vpop.eup %775 }
 0x546   :  { %v279_v5 = vadd.f32 1.0, %v776_v4 }
 0x548   :  { %777 = vrcp.f32 %v279_v5  ;;  %v291_v12 = vand.u32 2147483648, %v279_v5  ;;  %vm285_vm12 = vweird.f32 %v279_v5  ;;  %v289_v13 = vand.u32 2147483647, %v279_v5 }
 0x54a   :  { %v292_v15 = vor.u32 1.1754944e-38, %v291_v12  ;;  %vm290_vm14 = vcmp.eq.f32.partialorder %v289_v13, 8.507059e+37 }
 0x54e   :  { %v778_v6 = vpop.eup %777 }
 0x54f   :  { %v281_v7 = vmul.f32 %v778_v6, %v279_v5  ;;  %vm286_vm11 = vweird.f32 %v778_v6 }
 0x550   :  { %vm287_vm13 = vmor %vm285_vm12, %vm286_vm11 }
 0x551   :  { %v282_v8 = vsub.f32 1.0, %v281_v7 }
 0x553   :  { %v283_v10 = vmul.f32 %v778_v6, %v282_v8 }
 0x555   :  { %v284_v11 = vadd.f32 %v778_v6, %v283_v10 }
 0x557   :  { %v288_v14 = vsel %vm287_vm13, %v778_v6, %v284_v11 }
 0x558   :  { %v293_v17 = vsel %vm290_vm14, %v292_v15, %v288_v14 }
 0x559   :  { %v299_v20 = vmul.f32 %v297_v19, %v293_v17 }
 0x59e   :  { %v302_v16 = vpop.permute.xlu2 %301 }
 0x59f   :  { %v304_v18 = vmul.f32 %v302_v16, %v293_v17 }
 0x5a1   :  { %306 = vrot.lane.b32.xlu0 %v304_v18, %s960_s2 }
 0x613   :  { %v307_v21 = vpop.permute.xlu0 %306 }
 0x614   :  { %v309_v22 = vadd.f32 %v307_v21, %v299_v20 }
 0x616   :  { %779 = vtanh.f32 %v309_v22  ;;  %v367_v47 = vrot.slane %v309_v22, 7 }
 0x61c   :  { %v780_v23 = vpop.eup %779 }
 0x61d   :  { %312 = vrot.lane.b32.xlu1 %v780_v23, %s960_s2 }
 0x68f   :  { %v313_v24 = vpop.permute.xlu1 %312 }
 0x690   :  { %v315_v25 = vmul.f32 %v313_v24, %v293_v17 }
 0x692   :  { %v317_v26 = vrot.slane %v315_v25, 2 }
 0x694   :  { %318 = vrot.lane.b32.xlu2 %v317_v26, %s961_s3 }
 0x6ee   :  { %v319_v27 = vpop.permute.xlu2 %318 }
 0x6ef   :  { %736 = vmatmul.msk.f32.vlgmr.msrb.gmra.mxu0 %vm115_vm6, %v319_v27 }
 0x76c   :  { %v339_v28 = vpop.f32.mrf.mxu0 }
 0x76d   :  { %v343_v29 = vrot.slane %v339_v28, 5 }
 0x76f   :  { %v345_v30 = vadd.f32 %v343_v29, %v1001_v9 }
 0x771   :  { %781 = vtanh.f32 %v345_v30  ;;  %v737_v32 = vmul.f32 -1.442695, %v345_v30 }
 0x773   :  { %783 = vpow2.f32 %v737_v32 }
 0x777   :  { %v782_v31 = vpop.eup %781 }
 0x778   :  { %371 = vrot.lane.b32.xlu0 %v782_v31, %s960_s2 }
 0x779   :  { %v784_v33 = vpop.eup %783 }
 0x77a   :  { %v349_v34 = vadd.f32 1.0, %v784_v33 }
 0x77c   :  { %785 = vrcp.f32 %v349_v34  ;;  %v361_v40 = vand.u32 2147483648, %v349_v34  ;;  %vm355_vm1 = vweird.f32 %v349_v34  ;;  %v359_v41 = vand.u32 2147483647, %v349_v34 }
 0x77e   :  { %v362_v43 = vor.u32 1.1754944e-38, %v361_v40  ;;  %vm360_vm3 = vcmp.eq.f32.partialorder %v359_v41, 8.507059e+37 }
 0x782   :  { %v786_v35 = vpop.eup %785 }
 0x783   :  { %v351_v36 = vmul.f32 %v786_v35, %v349_v34  ;;  %vm356_vm15 = vweird.f32 %v786_v35 }
 0x784   :  { %vm357_vm2 = vmor %vm355_vm1, %vm356_vm15 }
 0x785   :  { %v352_v37 = vsub.f32 1.0, %v351_v36 }
 0x787   :  { %v353_v38 = vmul.f32 %v786_v35, %v352_v37 }
 0x789   :  { %v354_v39 = vadd.f32 %v786_v35, %v353_v38 }
 0x78b   :  { %v358_v42 = vsel %vm357_vm2, %v786_v35, %v354_v39 }
 0x78c   :  { %v363_v45 = vsel %vm360_vm3, %v362_v43, %v358_v42 }
 0x78d   :  { %v369_v48 = vmul.f32 %v367_v47, %v363_v45 }
 0x7ea   :  { %v372_v44 = vpop.permute.xlu0 %371 }
 0x7eb   :  { %v374_v46 = vmul.f32 %v372_v44, %v363_v45 }
 0x7ed   :  { %376 = vrot.lane.b32.xlu1 %v374_v46, %s960_s2 }
 0x85f   :  { %v377_v49 = vpop.permute.xlu1 %376 }
 0x860   :  { %v379_v50 = vadd.f32 %v377_v49, %v369_v48 }
 0x862   :  { %787 = vtanh.f32 %v379_v50  ;;  %v437_v12 = vrot.slane %v379_v50, 7 }
 0x868   :  { %v788_v51 = vpop.eup %787 }
 0x869   :  { %382 = vrot.lane.b32.xlu2 %v788_v51, %s960_s2 }
 0x8c3   :  { %v383_v52 = vpop.permute.xlu2 %382 }
 0x8c4   :  { %v385_v53 = vmul.f32 %v383_v52, %v363_v45 }
 0x8c6   :  { %v387_v54 = vrot.slane %v385_v53, 3 }
 0x8c8   :  { %388 = vrot.lane.b32.xlu0 %v387_v54, %s961_s3 }
 0x93a   :  { %v389_v55 = vpop.permute.xlu0 %388 }
 0x93b   :  { %738 = vmatmul.msk.f32.vlgmr.msrb.gmra.mxu1 %vm115_vm6, %v389_v55 }
 0x9b8   :  { %v409_v56 = vpop.f32.mrf.mxu1 }
 0x9b9   :  { %v413_v57 = vrot.slane %v409_v56, 4 }
 0x9bb   :  { %v415_v58 = vadd.f32 %v413_v57, %v1001_v9 }
 0x9bd   :  { %789 = vtanh.f32 %v415_v58  ;;  %v739_v60 = vmul.f32 -1.442695, %v415_v58 }
 0x9bf   :  { %791 = vpow2.f32 %v739_v60 }
 0x9c3   :  { %v790_v59 = vpop.eup %789 }
 0x9c4   :  { %441 = vrot.lane.b32.xlu1 %v790_v59, %s960_s2 }
 0x9c5   :  { %v792_v61 = vpop.eup %791 }
 0x9c6   :  { %v419_v62 = vadd.f32 1.0, %v792_v61 }
 0x9c8   :  { %793 = vrcp.f32 %v419_v62  ;;  %v431_v4 = vand.u32 2147483648, %v419_v62  ;;  %vm425_vm5 = vweird.f32 %v419_v62  ;;  %v429_v5 = vand.u32 2147483647, %v419_v62 }
 0x9ca   :  { %v432_v7 = vor.u32 1.1754944e-38, %v431_v4  ;;  %vm430_vm8 = vcmp.eq.f32.partialorder %v429_v5, 8.507059e+37 }
 0x9ce   :  { %v794_v63 = vpop.eup %793 }
 0x9cf   :  { %v421_v0 = vmul.f32 %v794_v63, %v419_v62  ;;  %vm426_vm4 = vweird.f32 %v794_v63 }
 0x9d0   :  { %vm427_vm7 = vmor %vm425_vm5, %vm426_vm4 }
 0x9d1   :  { %v422_v1 = vsub.f32 1.0, %v421_v0 }
 0x9d3   :  { %v423_v2 = vmul.f32 %v794_v63, %v422_v1 }
 0x9d5   :  { %v424_v3 = vadd.f32 %v794_v63, %v423_v2 }
 0x9d7   :  { %v428_v6 = vsel %vm427_vm7, %v794_v63, %v424_v3 }
 0x9d8   :  { %v433_v10 = vsel %vm430_vm8, %v432_v7, %v428_v6 }
 0x9d9   :  { %v439_v13 = vmul.f32 %v437_v12, %v433_v10 }
 0xa36   :  { %v442_v8 = vpop.permute.xlu1 %441 }
 0xa37   :  { %v444_v11 = vmul.f32 %v442_v8, %v433_v10 }
 0xa39   :  { %446 = vrot.lane.b32.xlu2 %v444_v11, %s960_s2 }
 0xa93   :  { %v447_v14 = vpop.permute.xlu2 %446 }
 0xa94   :  { %v449_v15 = vadd.f32 %v447_v14, %v439_v13 }
 0xa96   :  { %795 = vtanh.f32 %v449_v15  ;;  %v507_v40 = vrot.slane %v449_v15, 7 }
 0xa9c   :  { %v796_v16 = vpop.eup %795 }
 0xa9d   :  { %452 = vrot.lane.b32.xlu0 %v796_v16, %s960_s2 }
 0xb0f   :  { %v453_v17 = vpop.permute.xlu0 %452 }
 0xb10   :  { %v455_v18 = vmul.f32 %v453_v17, %v433_v10 }
 0xb12   :  { %v457_v19 = vrot.slane %v455_v18, 4 }
 0xb14   :  { %458 = vrot.lane.b32.xlu1 %v457_v19, %s961_s3 }
 0xb86   :  { %v459_v20 = vpop.permute.xlu1 %458 }
 0xb87   :  { %740 = vmatmul.msk.f32.vlgmr.msrb.gmra.mxu2 %vm115_vm6, %v459_v20 }
 0xc0a   :  { %v479_v21 = vpop.f32.mrf.mxu2 }
 0xc0b   :  { %v483_v22 = vrot.slane %v479_v21, 3 }
 0xc0d   :  { %v485_v23 = vadd.f32 %v483_v22, %v1001_v9 }
 0xc0f   :  { %797 = vtanh.f32 %v485_v23  ;;  %v741_v25 = vmul.f32 -1.442695, %v485_v23 }
 0xc11   :  { %799 = vpow2.f32 %v741_v25 }
 0xc15   :  { %v798_v24 = vpop.eup %797 }
 0xc16   :  { %511 = vrot.lane.b32.xlu2 %v798_v24, %s960_s2 }
 0xc17   :  { %v800_v26 = vpop.eup %799 }
 0xc18   :  { %v489_v27 = vadd.f32 1.0, %v800_v26 }
 0xc1a   :  { %801 = vrcp.f32 %v489_v27  ;;  %v501_v33 = vand.u32 2147483648, %v489_v27  ;;  %vm495_vm10 = vweird.f32 %v489_v27  ;;  %v499_v34 = vand.u32 2147483647, %v489_v27 }
 0xc1c   :  { %v502_v36 = vor.u32 1.1754944e-38, %v501_v33  ;;  %vm500_vm12 = vcmp.eq.f32.partialorder %v499_v34, 8.507059e+37 }
 0xc20   :  { %v802_v28 = vpop.eup %801 }
 0xc21   :  { %v491_v29 = vmul.f32 %v802_v28, %v489_v27  ;;  %vm496_vm9 = vweird.f32 %v802_v28 }
 0xc22   :  { %vm497_vm11 = vmor %vm495_vm10, %vm496_vm9 }
 0xc23   :  { %v492_v30 = vsub.f32 1.0, %v491_v29 }
 0xc25   :  { %v493_v31 = vmul.f32 %v802_v28, %v492_v30 }
 0xc27   :  { %v494_v32 = vadd.f32 %v802_v28, %v493_v31 }
 0xc29   :  { %v498_v35 = vsel %vm497_vm11, %v802_v28, %v494_v32 }
 0xc2a   :  { %v503_v38 = vsel %vm500_vm12, %v502_v36, %v498_v35 }
 0xc2b   :  { %v509_v41 = vmul.f32 %v507_v40, %v503_v38  ;;  %v666_v40 = vld [vmem:[#allocation8] sm:$0xff] }
 0xc70   :  { %v512_v37 = vpop.permute.xlu2 %511 }
 0xc71   :  { %v514_v39 = vmul.f32 %v512_v37, %v503_v38  ;;  %v669_v37 = vld [vmem:[#allocation8 + $0x18] sm:$0xff] }
 0xc72   :  { %689 = vmatpush.msra.mxu1 %v669_v37 }
 0xc73   :  { %516 = vrot.lane.b32.xlu0 %v514_v39, %s960_s2  ;;  %v667_v39 = vld [vmem:[#allocation8 + $0x8] sm:$0xff] }
 0xce5   :  { %v517_v42 = vpop.permute.xlu0 %516 }
 0xce6   :  { %v519_v43 = vadd.f32 %v517_v42, %v509_v41 }
 0xce8   :  { %803 = vtanh.f32 %v519_v43  ;;  %v577_v4 = vrot.slane %v519_v43, 7 }
 0xcee   :  { %v804_v44 = vpop.eup %803 }
 0xcef   :  { %522 = vrot.lane.b32.xlu1 %v804_v44, %s960_s2 }
 0xd61   :  { %v523_v45 = vpop.permute.xlu1 %522 }
 0xd62   :  { %v525_v46 = vmul.f32 %v523_v45, %v503_v38  ;;  %v668_v38 = vld [vmem:[#allocation8 + $0x10] sm:$0xff]  ;;  %v670_v45 = vld [vmem:[#allocation8 + $0x20] sm:$0x1] }
 0xd63   :  { %690 = vmatpush.msra.mxu1 %v668_v38 }
 0xd64   :  { %v527_v47 = vrot.slane %v525_v46, 5 }
 0xd65   :  { %691 = vmatpush.msra.mxu1 %v667_v39 }
 0xd66   :  { %528 = vrot.lane.b32.xlu2 %v527_v47, %s961_s3 }
 0xd67   :  { %692 = vmatpush.msra.mxu1 %v666_v40 }
 0xdc0   :  { %v529_v48 = vpop.permute.xlu2 %528 }
 0xdc1   :  { %742 = vmatmul.msk.f32.vlgmr.msrb.gmra.mxu3 %vm115_vm6, %v529_v48 }
 0xe44   :  { %v549_v49 = vpop.f32.mrf.mxu3 }
 0xe45   :  { %v553_v50 = vrot.slane %v549_v49, 2 }
 0xe47   :  { %v555_v51 = vadd.f32 %v553_v50, %v1001_v9 }
 0xe49   :  { %805 = vtanh.f32 %v555_v51  ;;  %v743_v53 = vmul.f32 -1.442695, %v555_v51 }
 0xe4b   :  { %807 = vpow2.f32 %v743_v53 }
 0xe4f   :  { %v806_v52 = vpop.eup %805 }
 0xe50   :  { %581 = vrot.lane.b32.xlu0 %v806_v52, %s960_s2 }
 0xe51   :  { %v808_v54 = vpop.eup %807 }
 0xe52   :  { %v559_v55 = vadd.f32 1.0, %v808_v54 }
 0xe54   :  { %809 = vrcp.f32 %v559_v55  ;;  %v571_v61 = vand.u32 2147483648, %v559_v55  ;;  %vm565_vm14 = vweird.f32 %v559_v55  ;;  %v569_v62 = vand.u32 2147483647, %v559_v55 }
 0xe56   :  { %v572_v0 = vor.u32 1.1754944e-38, %v571_v61  ;;  %vm570_vm1 = vcmp.eq.f32.partialorder %v569_v62, 8.507059e+37 }
 0xe5a   :  { %v810_v56 = vpop.eup %809 }
 0xe5b   :  { %v561_v57 = vmul.f32 %v810_v56, %v559_v55  ;;  %vm566_vm13 = vweird.f32 %v810_v56 }
 0xe5c   :  { %vm567_vm15 = vmor %vm565_vm14, %vm566_vm13 }
 0xe5d   :  { %v562_v58 = vsub.f32 1.0, %v561_v57 }
 0xe5f   :  { %v563_v59 = vmul.f32 %v810_v56, %v562_v58 }
 0xe61   :  { %v564_v60 = vadd.f32 %v810_v56, %v563_v59 }
 0xe63   :  { %v568_v63 = vsel %vm567_vm15, %v810_v56, %v564_v60 }
 0xe64   :  { %v573_v2 = vsel %vm570_vm1, %v572_v0, %v568_v63 }
 0xe65   :  { %v579_v5 = vmul.f32 %v577_v4, %v573_v2 }
 0xec2   :  { %v582_v1 = vpop.permute.xlu0 %581 }
 0xec3   :  { %v584_v3 = vmul.f32 %v582_v1, %v573_v2 }
 0xec5   :  { %586 = vrot.lane.b32.xlu1 %v584_v3, %s960_s2 }
 0xf37   :  { %v587_v6 = vpop.permute.xlu1 %586 }
 0xf38   :  { %v589_v7 = vadd.f32 %v587_v6, %v579_v5 }
 0xf3a   :  { %811 = vtanh.f32 %v589_v7  ;;  %v647_v32 = vrot.slane %v589_v7, 7 }
 0xf40   :  { %v812_v8 = vpop.eup %811 }
 0xf41   :  { %592 = vrot.lane.b32.xlu2 %v812_v8, %s960_s2 }
 0xf9b   :  { %v593_v10 = vpop.permute.xlu2 %592 }
 0xf9c   :  { %v595_v11 = vmul.f32 %v593_v10, %v573_v2 }
 0xf9e   :  { %v597_v12 = vrot.slane %v595_v11, 6 }
 0xfa0   :  { %598 = vrot.lane.b32.xlu0 %v597_v12, %s961_s3 }
0x1012   :  { %v599_v13 = vpop.permute.xlu0 %598 }
0x1013   :  { %744 = vmatmul.msk.f32.vlgmr.msra.gmra.mxu0 %vm115_vm6, %v599_v13 }
0x1090   :  { %v619_v14 = vpop.f32.mrf.mxu0 }
0x1091   :  { %v623_v15 = vrot.slane %v619_v14, 1 }
0x1093   :  { %v625_v16 = vadd.f32 %v623_v15, %v1001_v9 }
0x1095   :  { %813 = vtanh.f32 %v625_v16  ;;  %v745_v18 = vmul.f32 -1.442695, %v625_v16 }
0x1097   :  { %815 = vpow2.f32 %v745_v18 }
0x109b   :  { %v814_v17 = vpop.eup %813 }
0x109c   :  { %651 = vrot.lane.b32.xlu1 %v814_v17, %s960_s2 }
0x109d   :  { %v816_v19 = vpop.eup %815 }
0x109e   :  { %v629_v20 = vadd.f32 1.0, %v816_v19 }
0x10a0   :  { %817 = vrcp.f32 %v629_v20  ;;  %v641_v26 = vand.u32 2147483648, %v629_v20  ;;  %vm635_vm3 = vweird.f32 %v629_v20  ;;  %v639_v27 = vand.u32 2147483647, %v629_v20 }
0x10a2   :  { %v642_v28 = vor.u32 1.1754944e-38, %v641_v26  ;;  %vm640_vm5 = vcmp.eq.f32.partialorder %v639_v27, 8.507059e+37 }
0x10a6   :  { %v818_v21 = vpop.eup %817 }
0x10a7   :  { %v631_v22 = vmul.f32 %v818_v21, %v629_v20  ;;  %vm636_vm2 = vweird.f32 %v818_v21 }
0x10a8   :  { %vm637_vm4 = vmor %vm635_vm3, %vm636_vm2 }
0x10a9   :  { %v632_v23 = vsub.f32 1.0, %v631_v22 }
0x10ab   :  { %v633_v24 = vmul.f32 %v818_v21, %v632_v23 }
0x10ad   :  { %v634_v25 = vadd.f32 %v818_v21, %v633_v24 }
0x10af   :  { %v638_v9 = vsel %vm637_vm4, %v818_v21, %v634_v25 }
0x10b0   :  { %v643_v30 = vsel %vm640_vm5, %v642_v28, %v638_v9 }
0x10b1   :  { %v649_v33 = vmul.f32 %v647_v32, %v643_v30 }
0x110e   :  { %v652_v29 = vpop.permute.xlu1 %651 }
0x110f   :  { %v654_v31 = vmul.f32 %v652_v29, %v643_v30 }
0x1111   :  { %656 = vrot.lane.b32.xlu2 %v654_v31, %s960_s2 }
0x116b   :  { %v657_v34 = vpop.permute.xlu2 %656 }
0x116c   :  { %v659_v35 = vadd.f32 %v657_v34, %v649_v33 }
0x116e   :  { %819 = vtanh.f32 %v659_v35 }
0x1174   :  { %v820_v36 = vpop.eup %819 }
0x1175   :  { %662 = vrot.lane.b32.xlu0 %v820_v36, %s960_s2 }
0x11e7   :  { %v663_v41 = vpop.permute.xlu0 %662 }
0x11e8   :  { %v665_v42 = vmul.f32 %v663_v41, %v643_v30 }
0x11ea   :  { %v672_v43 = vrot.slane %v665_v42, 7 }
0x11ec   :  { %673 = vrot.lane.b32.xlu1 %v672_v43, %s961_s3 }
0x125e   :  { %v674_v44 = vpop.permute.xlu1 %673 }
0x125f   :  { %746 = vmatmul.msk.f32.vlgmr.msra.gmra.mxu1 %vm115_vm6, %v674_v44 }
0x12dc   :  { %v694_v46 = vpop.f32.mrf.mxu1 }
0x12dd   :  { %v695_v47 = vadd.f32 %v694_v46, %v670_v45 }
0x12df   :  { %v697_v48 = vsel %vm87_vm0, %v695_v47, -inf }
0x12e0   :  { %698 = vmax.xlane.f32.xlu2 %v697_v48 }
0x1353   :  { %v699_v49 = vpop.xlane.xlu2 %698 }
0x1354   :  { %v700_v50 = vsub.f32 %v695_v47, %v699_v49 }
0x1356   :  { %v701_v51 = vmul.f32 1.442695, %v700_v50 }
0x1358   :  { %821 = vpow2.f32 %v701_v51 }
0x135e   :  { %v822_v52 = vpop.eup %821 }
0x135f   :  { %v703_v53 = vsel %vm87_vm0, %v822_v52, 0.0 }
0x1360   :  { %704 = vadd.xlane.f32.xlu0 %v703_v53 }
0x13d3   :  { %v705_v54 = vpop.xlane.xlu0 %704 }
0x13d4   :  { %823 = vlog2.f32 %v705_v54 }
0x13da   :  { %v824_v55 = vpop.eup %823 }
0x13db   :  { %v707_v56 = vmul.f32 0.6931472, %v824_v55 }
0x13dd   :  { %v708_v57 = vsub.f32 %v700_v50, %v707_v56 }
0x13df   :  { %709 = vst [vmem:[#allocation10] sm:$0x1] %v708_v57 }
0x13e0   :  { %720 = dma.vmem_to_hbm [thread:$0]  %s716_s10, 16, %s718_s13, [#allocation4]  }
0x13e1   :  { %951 = dma.done.wait [#allocation4], 16  }
0x13e2   :  { %952 = vsyncadd [#allocation4], 4294967280 }
0x13e3   :  { %725 = vsyncpa [#allocation3], 1 }
0x13e4   :  { %726 = vsyncpa [#allocation6], 1 }
0x13e5   :  { %727 = vsyncpa [#allocation9], 1 }
0x13e6   :  { %728 = vsyncpa [#allocation4], 1 }

</bundles_post_ra>
